<compile_context>
chip_gen: v5e
topology: v5e:2x2
jax: 0.10.0
libtpu: 0.0.40
codegen_flags: <defaults>
</compile_context>

<pallas_src>
import functools

import jax
import jax.numpy as jnp
from jax.experimental import pallas as pl
from jax.experimental.pallas import tpu as pltpu

LANE = 128
SUBLANE = 8
HIDDEN = 200


def _round_up(x, m):
    return ((x + m - 1) // m) * m


def mlp_kernel(x_ref, w1_ref, b1_ref, w2_ref, b2_ref, w3_ref, b3_ref, o_ref):
    x = x_ref[...]
    # fc1 + ReLU (f32 accumulation on the MXU, bias/ReLU on the f32 tile)
    h1 = jnp.dot(x.astype(w1_ref.dtype), w1_ref[...],
                 preferred_element_type=jnp.float32)
    h1 = jnp.maximum(h1 + b1_ref[...], 0.0)
    # fc2 + ReLU
    h2 = jnp.dot(h1.astype(w2_ref.dtype), w2_ref[...],
                 preferred_element_type=jnp.float32)
    h2 = jnp.maximum(h2 + b2_ref[...], 0.0)
    # fc3 (no activation)
    out = jnp.dot(h2.astype(w3_ref.dtype), w3_ref[...],
                  preferred_element_type=jnp.float32)
    o_ref[...] = (out + b3_ref[...]).astype(o_ref.dtype)


def _pad_params(params, matmul_dtype):
    """Zero-pad hidden -> 256 and output -> multiple of 128; cast weights."""
    w1, b1 = params["w1"], params["b1"]
    w2, b2 = params["w2"], params["b2"]
    w3, b3 = params["w3"], params["b3"]
    in_size, hidden = w1.shape
    out_size = w3.shape[1]
    hid_p = _round_up(hidden, LANE)     # 200 -> 256
    out_p = _round_up(out_size, LANE)   # e.g. 10 -> 128 (lane-dense store)

    w1p = jnp.zeros((in_size, hid_p), matmul_dtype)
    w1p = w1p.at[:, :hidden].set(w1.astype(matmul_dtype))
    b1p = jnp.zeros((1, hid_p), jnp.float32).at[:, :hidden].set(b1.reshape(1, -1))

    w2p = jnp.zeros((hid_p, hid_p), matmul_dtype)
    w2p = w2p.at[:hidden, :hidden].set(w2.astype(matmul_dtype))
    b2p = jnp.zeros((1, hid_p), jnp.float32).at[:, :hidden].set(b2.reshape(1, -1))

    w3p = jnp.zeros((hid_p, out_p), matmul_dtype)
    w3p = w3p.at[:hidden, :out_size].set(w3.astype(matmul_dtype))
    b3p = jnp.zeros((1, out_p), jnp.float32).at[:, :out_size].set(b3.reshape(1, -1))

    return (w1p, b1p, w2p, b2p, w3p, b3p), hid_p, out_p


@functools.partial(jax.jit, static_argnames=("block_m", "matmul_dtype"))
def sunflower_mlp(x, params, *, block_m=512, matmul_dtype=jnp.float32):
    """Fused 3-layer MLP forward.

    x: [B, input_size] float32
    params: w1 [in,200], b1 [1,200] (or [200]), w2 [200,200], b2, w3 [200,out], b3
            (weights already transposed to [in, out] vs. PyTorch).
    """
    B, in_size = x.shape
    out_size = params["w3"].shape[1]
    (w1p, b1p, w2p, b2p, w3p, b3p), hid_p, out_p = _pad_params(params, matmul_dtype)

    # Batch tiling: sublane-aligned TM, capped so the VMEM working set stays
    # small even on v7x (64 MiB physical / 32 MiB default scoped VMEM).
    tm = min(block_m, _round_up(B, SUBLANE))
    tm = _round_up(tm, SUBLANE)
    b_pad = _round_up(B, tm)
    if b_pad != B:
        x = jnp.zeros((b_pad, in_size), x.dtype).at[:B].set(x)

    grid = (b_pad // tm,)
    resident = lambda i: (0, 0)  # constant block index => weights stay in VMEM

    out_padded = pl.pallas_call(
        mlp_kernel,
        out_shape=jax.ShapeDtypeStruct((b_pad, out_p), jnp.float32),
        grid=grid,
        in_specs=[
            pl.BlockSpec((tm, in_size), lambda i: (i, 0)),   # x tile (pipelined)
            pl.BlockSpec((in_size, hid_p), resident),        # w1
            pl.BlockSpec((1, hid_p), resident),              # b1
            pl.BlockSpec((hid_p, hid_p), resident),          # w2
            pl.BlockSpec((1, hid_p), resident),              # b2
            pl.BlockSpec((hid_p, out_p), resident),          # w3
            pl.BlockSpec((1, out_p), resident),              # b3
        ],
        out_specs=pl.BlockSpec((tm, out_p), lambda i: (i, 0)),
        compiler_params=pltpu.CompilerParams(
            dimension_semantics=("parallel",),   # megacore-shard batch on v7x
        ),
    )(x, w1p, b1p, w2p, b2p, w3p, b3p)

    return out_padded[:B, :out_size]


def init_params(key, input_size, output_size):
    """Deterministic init mimicking nn.Linear's U(-1/sqrt(fan_in), 1/sqrt(fan_in))."""
    def linear(k, fan_in, fan_out):
        kw, kb = jax.random.split(k)
        bound = 1.0 / jnp.sqrt(fan_in)
        # stored as [in, out] so the kernel does x @ W
        w = jax.random.uniform(kw, (fan_in, fan_out), jnp.float32, -bound, bound)
        b = jax.random.uniform(kb, (1, fan_out), jnp.float32, -bound, bound)
        return w, b

    k1, k2, k3 = jax.random.split(key, 3)
    w1, b1 = linear(k1, input_size, HIDDEN)
    w2, b2 = linear(k2, HIDDEN, HIDDEN)
    w3, b3 = linear(k3, HIDDEN, output_size)
    return {"w1": w1, "b1": b1, "w2": w2, "b2": b2, "w3": w3, "b3": b3}


def reference_forward(x, p):
    h1 = jnp.maximum(x @ p["w1"] + p["b1"], 0.0)
    h2 = jnp.maximum(h1 @ p["w2"] + p["b2"], 0.0)
    return h2 @ p["w3"] + p["b3"]


if __name__ == "__main__":
    input_size = 32
    output_size = 10
    batch = 8

    key = jax.random.PRNGKey(0)
    kx, kp, kx2 = jax.random.split(key, 3)
    x = jax.random.normal(kx, (batch, input_size), jnp.float32)
    params = init_params(kp, input_size, output_size)

    # Small-batch inference path (single grid step), f32 weights.
    out = sunflower_mlp(x, params)
    out = jax.block_until_ready(out)
    ref = reference_forward(x, params)
    assert out.shape == (batch, output_size)
    assert jnp.allclose(out, ref, atol=1e-4, rtol=1e-4)

    # Larger batch exercises the batch grid (multiple tiles + batch padding).
    x_big = jax.random.normal(kx2, (1000, input_size), jnp.float32)
    out_big = jax.block_until_ready(
        sunflower_mlp(x_big, params, block_m=256))
    ref_big = reference_forward(x_big, params)
    assert out_big.shape == (1000, output_size)
    assert jnp.allclose(out_big, ref_big, atol=1e-4, rtol=1e-4)

    # Throughput configuration: bf16 weights on the MXU, f32 accumulation.
    out_bf16 = jax.block_until_ready(
        sunflower_mlp(x_big, params, block_m=256, matmul_dtype=jnp.bfloat16))
    assert out_bf16.shape == (1000, output_size)
    assert jnp.allclose(out_bf16, ref_big, atol=1e-1, rtol=1e-1)

    print("KERNEL_OK")
</pallas_src>

<mosaic_0001>
module attributes {stable_mosaic.version = 11 : i64} {
  func.func @mlp_kernel(%arg0: i32, %arg1: memref<8x32xf32, #tpu.memory_space<vmem>>, %arg2: memref<32x256xf32, #tpu.memory_space<vmem>>, %arg3: memref<1x256xf32, #tpu.memory_space<vmem>>, %arg4: memref<256x256xf32, #tpu.memory_space<vmem>>, %arg5: memref<1x256xf32, #tpu.memory_space<vmem>>, %arg6: memref<256x128xf32, #tpu.memory_space<vmem>>, %arg7: memref<1x128xf32, #tpu.memory_space<vmem>>, %arg8: memref<8x128xf32, #tpu.memory_space<vmem>>) attributes {dimension_semantics = [#tpu.dimension_semantics<parallel>], iteration_bounds = array<i64: 1>, scalar_prefetch = 0 : i64, scratch_operands = 0 : i64, tpu.core_type = #tpu.core_type<tc>, window_params = [{transform_indices = @transform_0, window_bounds = array<i64: 8, 32>}, {pipeline_mode = #tpu.pipeline_mode<synchronous>, transform_indices = @transform_1, window_bounds = array<i64: 32, 256>}, {pipeline_mode = #tpu.pipeline_mode<synchronous>, transform_indices = @transform_2, window_bounds = array<i64: 1, 256>}, {pipeline_mode = #tpu.pipeline_mode<synchronous>, transform_indices = @transform_3, window_bounds = array<i64: 256, 256>}, {pipeline_mode = #tpu.pipeline_mode<synchronous>, transform_indices = @transform_4, window_bounds = array<i64: 1, 256>}, {pipeline_mode = #tpu.pipeline_mode<synchronous>, transform_indices = @transform_5, window_bounds = array<i64: 256, 128>}, {pipeline_mode = #tpu.pipeline_mode<synchronous>, transform_indices = @transform_6, window_bounds = array<i64: 1, 128>}, {transform_indices = @transform_7, window_bounds = array<i64: 8, 128>}]} {
    %c0 = arith.constant 0 : index
    %c0_0 = arith.constant 0 : index
    %0 = vector.load %arg1[%c0, %c0_0] : memref<8x32xf32, #tpu.memory_space<vmem>>, vector<8x32xf32>
    %c0_1 = arith.constant 0 : index
    %c0_2 = arith.constant 0 : index
    %1 = vector.load %arg2[%c0_1, %c0_2] : memref<32x256xf32, #tpu.memory_space<vmem>>, vector<32x256xf32>
    %cst = arith.constant dense<0.000000e+00> : vector<8x256xf32>
    %2 = tpu.matmul %0, %1, %cst {dimension_numbers = #tpu.dot_dimension_numbers<[1], [0], [0], [1], [0, 0, 1, 1], [], []>} : vector<8x32xf32>, vector<32x256xf32>, vector<8x256xf32> -> vector<8x256xf32>
    %c0_3 = arith.constant 0 : index
    %c0_4 = arith.constant 0 : index
    %3 = vector.load %arg3[%c0_3, %c0_4] : memref<1x256xf32, #tpu.memory_space<vmem>>, vector<1x256xf32>
    %4 = vector.broadcast %3 : vector<1x256xf32> to vector<8x256xf32>
    %5 = arith.addf %2, %4 : vector<8x256xf32>
    %cst_5 = arith.constant 0.000000e+00 : f32
    %6 = vector.broadcast %cst_5 : f32 to vector<8x256xf32>
    %7 = arith.maximumf %5, %6 : vector<8x256xf32>
    %c0_6 = arith.constant 0 : index
    %c0_7 = arith.constant 0 : index
    %8 = vector.load %arg4[%c0_6, %c0_7] : memref<256x256xf32, #tpu.memory_space<vmem>>, vector<256x256xf32>
    %cst_8 = arith.constant dense<0.000000e+00> : vector<8x256xf32>
    %9 = tpu.matmul %7, %8, %cst_8 {dimension_numbers = #tpu.dot_dimension_numbers<[1], [0], [0], [1], [0, 0, 1, 1], [], []>} : vector<8x256xf32>, vector<256x256xf32>, vector<8x256xf32> -> vector<8x256xf32>
    %c0_9 = arith.constant 0 : index
    %c0_10 = arith.constant 0 : index
    %10 = vector.load %arg5[%c0_9, %c0_10] : memref<1x256xf32, #tpu.memory_space<vmem>>, vector<1x256xf32>
    %11 = vector.broadcast %10 : vector<1x256xf32> to vector<8x256xf32>
    %12 = arith.addf %9, %11 : vector<8x256xf32>
    %cst_11 = arith.constant 0.000000e+00 : f32
    %13 = vector.broadcast %cst_11 : f32 to vector<8x256xf32>
    %14 = arith.maximumf %12, %13 : vector<8x256xf32>
    %c0_12 = arith.constant 0 : index
    %c0_13 = arith.constant 0 : index
    %15 = vector.load %arg6[%c0_12, %c0_13] : memref<256x128xf32, #tpu.memory_space<vmem>>, vector<256x128xf32>
    %cst_14 = arith.constant dense<0.000000e+00> : vector<8x128xf32>
    %16 = tpu.matmul %14, %15, %cst_14 {dimension_numbers = #tpu.dot_dimension_numbers<[1], [0], [0], [1], [0, 0, 1, 1], [], []>} : vector<8x256xf32>, vector<256x128xf32>, vector<8x128xf32> -> vector<8x128xf32>
    %c0_15 = arith.constant 0 : index
    %c0_16 = arith.constant 0 : index
    %17 = vector.load %arg7[%c0_15, %c0_16] : memref<1x128xf32, #tpu.memory_space<vmem>>, vector<1x128xf32>
    %18 = vector.broadcast %17 : vector<1x128xf32> to vector<8x128xf32>
    %19 = arith.addf %16, %18 : vector<8x128xf32>
    %c0_17 = arith.constant 0 : index
    %c0_18 = arith.constant 0 : index
    %20 = vector.load %arg8[%c0_17, %c0_18] : memref<8x128xf32, #tpu.memory_space<vmem>>, vector<8x128xf32>
    tpu.vector_store %arg8[%c0_17, %c0_18], %19 {strides = array<i32>} : memref<8x128xf32, #tpu.memory_space<vmem>>, vector<8x128xf32>,
    return
  }
  func.func @transform_0(%arg0: i32) -> (i32, i32) {
    %c0_i32 = arith.constant 0 : i32
    %c0_i32_0 = arith.constant 0 : i32
    return %arg0, %c0_i32 : i32, i32
  }
  func.func @transform_1(%arg0: i32) -> (i32, i32) {
    %c0_i32 = arith.constant 0 : i32
    %c0_i32_0 = arith.constant 0 : i32
    %c0_i32_1 = arith.constant 0 : i32
    return %c0_i32, %c0_i32_0 : i32, i32
  }
  func.func @transform_2(%arg0: i32) -> (i32, i32) {
    %c0_i32 = arith.constant 0 : i32
    %c0_i32_0 = arith.constant 0 : i32
    %c0_i32_1 = arith.constant 0 : i32
    return %c0_i32, %c0_i32_0 : i32, i32
  }
  func.func @transform_3(%arg0: i32) -> (i32, i32) {
    %c0_i32 = arith.constant 0 : i32
    %c0_i32_0 = arith.constant 0 : i32
    %c0_i32_1 = arith.constant 0 : i32
    return %c0_i32, %c0_i32_0 : i32, i32
  }
  func.func @transform_4(%arg0: i32) -> (i32, i32) {
    %c0_i32 = arith.constant 0 : i32
    %c0_i32_0 = arith.constant 0 : i32
    %c0_i32_1 = arith.constant 0 : i32
    return %c0_i32, %c0_i32_0 : i32, i32
  }
  func.func @transform_5(%arg0: i32) -> (i32, i32) {
    %c0_i32 = arith.constant 0 : i32
    %c0_i32_0 = arith.constant 0 : i32
    %c0_i32_1 = arith.constant 0 : i32
    return %c0_i32, %c0_i32_0 : i32, i32
  }
  func.func @transform_6(%arg0: i32) -> (i32, i32) {
    %c0_i32 = arith.constant 0 : i32
    %c0_i32_0 = arith.constant 0 : i32
    %c0_i32_1 = arith.constant 0 : i32
    return %c0_i32, %c0_i32_0 : i32, i32
  }
  func.func @transform_7(%arg0: i32) -> (i32, i32) {
    %c0_i32 = arith.constant 0 : i32
    %c0_i32_0 = arith.constant 0 : i32
    return %arg0, %c0_i32 : i32, i32
  }
}

</mosaic_0001>

<bundles_post_ra>
// kernel: sunflower_mlp.1
= control target key start
LH: loop header
LB: loop body
LE: loop exit
PB: predicated region body
PF: predicated region fallthrough
CT: control target
= control target key end

     0   :  { %vm42_vm0 = vcmask 261120   ;;  %s731_s0 = inlined_call_operand.vmem [shape: f32[8,32], index: 0, kind: input, shape index: {}]   ;;  %s732_s1 = inlined_call_operand.vmem [shape: f32[32,256], index: 1, kind: input, shape index: {}]   ;;  %s733_s2 = inlined_call_operand.vmem [shape: f32[1,256], index: 2, kind: input, shape index: {}]   ;;  %s734_s3 = inlined_call_operand.vmem [shape: f32[256,256], index: 3, kind: input, shape index: {}]   ;;  %s735_s4 = inlined_call_operand.vmem [shape: f32[1,256], index: 4, kind: input, shape index: {}]   ;;  %s736_s5 = inlined_call_operand.vmem [shape: f32[256,128], index: 5, kind: input, shape index: {}]   ;;  %s737_s6 = inlined_call_operand.vmem [shape: f32[1,128], index: 6, kind: input, shape index: {}]   ;;  %s738_s7 = inlined_call_operand.hbm [shape: f32[8,128], index: 7, kind: output, shape index: {}]  }
   0x1   :  { %v34_v0 = vld [vmem:[%s732_s1 + $0x30] sm:$0xff]  ;;  %v32_v1 = vld [vmem:[%s732_s1 + $0x20] sm:$0xff]  ;;  %v35_v2 = vld [vmem:[%s732_s1 + $0x38] sm:$0xff] }
   0x2   :  { %58 = vmatpush.msra.mxu0 %v34_v0  ;;  %78 = vmatpush.msra.mxu1 %v35_v2  ;;  %v33_v3 = vld [vmem:[%s732_s1 + $0x28] sm:$0xff]  ;;  %v30_v4 = vld [vmem:[%s732_s1 + $0x10] sm:$0xff]  ;;  %v31_v5 = vld [vmem:[%s732_s1 + $0x18] sm:$0xff] }
   0x3   :  { %v118_v6 = vld [vmem:[%s734_s3 + $0xf0] sm:$0xff]  ;;  %v116_v7 = vld [vmem:[%s734_s3 + $0xe0] sm:$0xff]  ;;  %v29_v9 = vld [vmem:[%s732_s1 + $0x8] sm:$0xff] }
   0x4   :  { %59 = vmatpush.msra.mxu0 %v32_v1  ;;  %79 = vmatpush.msra.mxu1 %v33_v3  ;;  %v28_v8 = vld [vmem:[%s732_s1] sm:$0xff]  ;;  %v150_v10 = vld [vmem:[%s734_s3 + $0x1f0] sm:$0xff]  ;;  %v119_v12 = vld [vmem:[%s734_s3 + $0xf8] sm:$0xff] }
   0x5   :  { %158 = vmatpush.msra.mxu2 %v118_v6  ;;  %v27_v11 = vld [vmem:[%s731_s0] sm:$0xff]  ;;  %178 = vmatpush.msra.mxu3 %v150_v10  ;;  %v151_v13 = vld [vmem:[%s734_s3 + $0x1f8] sm:$0xff]  ;;  %v114_v14 = vld [vmem:[%s734_s3 + $0xd0] sm:$0xff] }
   0x6   :  { %60 = vmatpush.msra.mxu0 %v30_v4  ;;  %80 = vmatpush.msra.mxu1 %v31_v5  ;;  %v148_v15 = vld [vmem:[%s734_s3 + $0x1e0] sm:$0xff]  ;;  %v117_v16 = vld [vmem:[%s734_s3 + $0xe8] sm:$0xff]  ;;  %v146_v19 = vld [vmem:[%s734_s3 + $0x1d0] sm:$0xff] }
   0x7   :  { %159 = vmatpush.msra.mxu2 %v116_v7  ;;  %v149_v17 = vld [vmem:[%s734_s3 + $0x1e8] sm:$0xff]  ;;  %v112_v18 = vld [vmem:[%s734_s3 + $0xc0] sm:$0xff]  ;;  %179 = vmatpush.msra.mxu3 %v148_v15  ;;  %v115_v20 = vld [vmem:[%s734_s3 + $0xd8] sm:$0xff] }
   0x8   :  { %61 = vmatpush.msra.mxu0 %v28_v8  ;;  %81 = vmatpush.msra.mxu1 %v29_v9  ;;  %v147_v21 = vld [vmem:[%s734_s3 + $0x1d8] sm:$0xff]  ;;  %v110_v22 = vld [vmem:[%s734_s3 + $0xb0] sm:$0xff]  ;;  %v144_v23 = vld [vmem:[%s734_s3 + $0x1c0] sm:$0xff] }
   0x9   :  { %333 = vmatmul.msk.f32.vlgmr.msra.gmra.mxu0 %vm42_vm0, %v27_v11  ;;  %334 = vmatmul.msk.f32.vlgmr.msra.gmra.mxu1 %vm42_vm0, %v27_v11  ;;  %v113_v24 = vld [vmem:[%s734_s3 + $0xc8] sm:$0xff]  ;;  %v108_v26 = vld [vmem:[%s734_s3 + $0xa0] sm:$0xff]  ;;  %v142_v27 = vld [vmem:[%s734_s3 + $0x1b0] sm:$0xff] }
   0xa   :  { %198 = vmatpush.msrb.mxu0 %v119_v12  ;;  %218 = vmatpush.msrb.mxu1 %v151_v13  ;;  %v145_v25 = vld [vmem:[%s734_s3 + $0x1c8] sm:$0xff]  ;;  %v111_v28 = vld [vmem:[%s734_s3 + $0xb8] sm:$0xff]  ;;  %v106_v30 = vld [vmem:[%s734_s3 + $0x90] sm:$0xff] }
   0xb   :  { %160 = vmatpush.msra.mxu2 %v114_v14  ;;  %180 = vmatpush.msra.mxu3 %v146_v19  ;;  %v143_v29 = vld [vmem:[%s734_s3 + $0x1b8] sm:$0xff]  ;;  %v140_v31 = vld [vmem:[%s734_s3 + $0x1a0] sm:$0xff]  ;;  %v109_v32 = vld [vmem:[%s734_s3 + $0xa8] sm:$0xff] }
   0xc   :  { %199 = vmatpush.msrb.mxu0 %v117_v16  ;;  %219 = vmatpush.msrb.mxu1 %v149_v17  ;;  %v141_v33 = vld [vmem:[%s734_s3 + $0x1a8] sm:$0xff]  ;;  %v104_v34 = vld [vmem:[%s734_s3 + $0x80] sm:$0xff]  ;;  %v138_v35 = vld [vmem:[%s734_s3 + $0x190] sm:$0xff] }
   0xd   :  { %161 = vmatpush.msra.mxu2 %v112_v18  ;;  %181 = vmatpush.msra.mxu3 %v144_v23  ;;  %v107_v36 = vld [vmem:[%s734_s3 + $0x98] sm:$0xff]  ;;  %v105_v38 = vld [vmem:[%s734_s3 + $0x88] sm:$0xff]  ;;  %v102_v39 = vld [vmem:[%s734_s3 + $0x70] sm:$0xff] }
   0xe   :  { %200 = vmatpush.msrb.mxu0 %v115_v20  ;;  %220 = vmatpush.msrb.mxu1 %v147_v21  ;;  %v139_v37 = vld [vmem:[%s734_s3 + $0x198] sm:$0xff]  ;;  %v136_v40 = vld [vmem:[%s734_s3 + $0x180] sm:$0xff]  ;;  %v137_v41 = vld [vmem:[%s734_s3 + $0x188] sm:$0xff] }
   0xf   :  { %162 = vmatpush.msra.mxu2 %v110_v22  ;;  %182 = vmatpush.msra.mxu3 %v142_v27 }
  0x10   :  { %201 = vmatpush.msrb.mxu0 %v113_v24  ;;  %221 = vmatpush.msrb.mxu1 %v145_v25 }
  0x11   :  { %163 = vmatpush.msra.mxu2 %v108_v26  ;;  %183 = vmatpush.msra.mxu3 %v140_v31 }
  0x12   :  { %202 = vmatpush.msrb.mxu0 %v111_v28  ;;  %222 = vmatpush.msrb.mxu1 %v143_v29 }
  0x13   :  { %164 = vmatpush.msra.mxu2 %v106_v30  ;;  %184 = vmatpush.msra.mxu3 %v138_v35 }
  0x14   :  { %203 = vmatpush.msrb.mxu0 %v109_v32  ;;  %223 = vmatpush.msrb.mxu1 %v141_v33 }
  0x15   :  { %165 = vmatpush.msra.mxu2 %v104_v34 }
  0x16   :  { %12 = vsyncpa [#allocation3], 0  ;;  %204 = vmatpush.msrb.mxu0 %v107_v36  ;;  %224 = vmatpush.msrb.mxu1 %v139_v37  ;;  %v100_v42 = vld [vmem:[%s734_s3 + $0x60] sm:$0xff]  ;;  %v134_v43 = vld [vmem:[%s734_s3 + $0x170] sm:$0xff] }
  0x17   :  { %166 = vmatpush.msra.mxu2 %v102_v39  ;;  %185 = vmatpush.msra.mxu3 %v136_v40  ;;  %v103_v44 = vld [vmem:[%s734_s3 + $0x78] sm:$0xff]  ;;  %v98_v46 = vld [vmem:[%s734_s3 + $0x50] sm:$0xff]  ;;  %v132_v47 = vld [vmem:[%s734_s3 + $0x160] sm:$0xff] }
  0x18   :  { %v135_v45 = vld [vmem:[%s734_s3 + $0x178] sm:$0xff]  ;;  %205 = vmatpush.msrb.mxu0 %v105_v38  ;;  %225 = vmatpush.msrb.mxu1 %v137_v41  ;;  %v101_v48 = vld [vmem:[%s734_s3 + $0x68] sm:$0xff]  ;;  %v96_v50 = vld [vmem:[%s734_s3 + $0x40] sm:$0xff] }
  0x19   :  { %167 = vmatpush.msra.mxu2 %v100_v42  ;;  %186 = vmatpush.msra.mxu3 %v134_v43  ;;  %v133_v49 = vld [vmem:[%s734_s3 + $0x168] sm:$0xff]  ;;  %v130_v51 = vld [vmem:[%s734_s3 + $0x150] sm:$0xff]  ;;  %v99_v52 = vld [vmem:[%s734_s3 + $0x58] sm:$0xff] }
  0x1a   :  { %206 = vmatpush.msrb.mxu0 %v103_v44  ;;  %226 = vmatpush.msrb.mxu1 %v135_v45  ;;  %v131_v53 = vld [vmem:[%s734_s3 + $0x158] sm:$0xff]  ;;  %v94_v54 = vld [vmem:[%s734_s3 + $0x30] sm:$0xff]  ;;  %v128_v55 = vld [vmem:[%s734_s3 + $0x140] sm:$0xff] }
  0x1b   :  { %168 = vmatpush.msra.mxu2 %v98_v46  ;;  %187 = vmatpush.msra.mxu3 %v132_v47  ;;  %v97_v56 = vld [vmem:[%s734_s3 + $0x48] sm:$0xff]  ;;  %v95_v58 = vld [vmem:[%s734_s3 + $0x38] sm:$0xff]  ;;  %v92_v59 = vld [vmem:[%s734_s3 + $0x20] sm:$0xff] }
  0x1c   :  { %207 = vmatpush.msrb.mxu0 %v101_v48  ;;  %227 = vmatpush.msrb.mxu1 %v133_v49  ;;  %v129_v57 = vld [vmem:[%s734_s3 + $0x148] sm:$0xff]  ;;  %v126_v60 = vld [vmem:[%s734_s3 + $0x130] sm:$0xff]  ;;  %v127_v62 = vld [vmem:[%s734_s3 + $0x138] sm:$0xff] }
  0x1d   :  { %169 = vmatpush.msra.mxu2 %v96_v50  ;;  %188 = vmatpush.msra.mxu3 %v130_v51  ;;  %v93_v61 = vld [vmem:[%s734_s3 + $0x28] sm:$0xff]  ;;  %v90_v63 = vld [vmem:[%s734_s3 + $0x10] sm:$0xff]  ;;  %v124_v0 = vld [vmem:[%s734_s3 + $0x120] sm:$0xff] }
  0x1e   :  { %208 = vmatpush.msrb.mxu0 %v99_v52  ;;  %228 = vmatpush.msrb.mxu1 %v131_v53  ;;  %v91_v1 = vld [vmem:[%s734_s3 + $0x18] sm:$0xff]  ;;  %v125_v2 = vld [vmem:[%s734_s3 + $0x128] sm:$0xff]  ;;  %v88_v3 = vld [vmem:[%s734_s3] sm:$0xff] }
  0x1f   :  { %170 = vmatpush.msra.mxu2 %v94_v54  ;;  %189 = vmatpush.msra.mxu3 %v128_v55  ;;  %v122_v4 = vld [vmem:[%s734_s3 + $0x110] sm:$0xff]  ;;  %v89_v5 = vld [vmem:[%s734_s3 + $0x8] sm:$0xff]  ;;  %v123_v6 = vld [vmem:[%s734_s3 + $0x118] sm:$0xff] }
  0x20   :  { %209 = vmatpush.msrb.mxu0 %v97_v56  ;;  %229 = vmatpush.msrb.mxu1 %v129_v57  ;;  %v120_v7 = vld [vmem:[%s734_s3 + $0x100] sm:$0xff]  ;;  %v121_v8 = vld [vmem:[%s734_s3 + $0x108] sm:$0xff]  ;;  %v271_v9 = vld [vmem:[%s736_s5 + $0xf8] sm:$0xff] }
  0x21   :  { %171 = vmatpush.msra.mxu2 %v92_v59  ;;  %190 = vmatpush.msra.mxu3 %v126_v60  ;;  %v270_v10 = vld [vmem:[%s736_s5 + $0xf0] sm:$0xff]  ;;  %v255_v11 = vld [vmem:[%s736_s5 + $0x78] sm:$0xff]  ;;  %v269_v13 = vld [vmem:[%s736_s5 + $0xe8] sm:$0xff] }
  0x22   :  { %210 = vmatpush.msrb.mxu0 %v95_v58  ;;  %230 = vmatpush.msrb.mxu1 %v127_v62  ;;  %v254_v12 = vld [vmem:[%s736_s5 + $0x70] sm:$0xff]  ;;  %v253_v14 = vld [vmem:[%s736_s5 + $0x68] sm:$0xff]  ;;  %v268_v15 = vld [vmem:[%s736_s5 + $0xe0] sm:$0xff] }
  0x23   :  { %172 = vmatpush.msra.mxu2 %v90_v63  ;;  %191 = vmatpush.msra.mxu3 %v124_v0  ;;  %v252_v16 = vld [vmem:[%s736_s5 + $0x60] sm:$0xff]  ;;  %v267_v17 = vld [vmem:[%s736_s5 + $0xd8] sm:$0xff]  ;;  %v266_v19 = vld [vmem:[%s736_s5 + $0xd0] sm:$0xff] }
  0x24   :  { %211 = vmatpush.msrb.mxu0 %v93_v61  ;;  %231 = vmatpush.msrb.mxu1 %v125_v2  ;;  %v251_v18 = vld [vmem:[%s736_s5 + $0x58] sm:$0xff]  ;;  %v250_v20 = vld [vmem:[%s736_s5 + $0x50] sm:$0xff]  ;;  %v265_v21 = vld [vmem:[%s736_s5 + $0xc8] sm:$0xff] }
  0x25   :  { %173 = vmatpush.msra.mxu2 %v88_v3  ;;  %192 = vmatpush.msra.mxu3 %v122_v4  ;;  %v249_v22 = vld [vmem:[%s736_s5 + $0x48] sm:$0xff]  ;;  %v264_v23 = vld [vmem:[%s736_s5 + $0xc0] sm:$0xff]  ;;  %v263_v25 = vld [vmem:[%s736_s5 + $0xb8] sm:$0xff] }
  0x26   :  { %212 = vmatpush.msrb.mxu0 %v91_v1  ;;  %232 = vmatpush.msrb.mxu1 %v123_v6  ;;  %v248_v24 = vld [vmem:[%s736_s5 + $0x40] sm:$0xff]  ;;  %v247_v26 = vld [vmem:[%s736_s5 + $0x38] sm:$0xff]  ;;  %v262_v27 = vld [vmem:[%s736_s5 + $0xb0] sm:$0xff] }
  0x27   :  { %193 = vmatpush.msra.mxu3 %v120_v7  ;;  %276 = vmatpush.msrb.mxu2 %v255_v11  ;;  %v261_v28 = vld [vmem:[%s736_s5 + $0xa8] sm:$0xff]  ;;  %v36_v29 = vld [vmem:[%s733_s2] sm:$0x3]  ;;  %v246_v39 = vld [vmem:[%s736_s5 + $0x30] sm:$0xff]  ;;  %s324_s2 = sshll.u32 %s738_s7, 4  ;;  %s325_s2 = int_to_ptr.hbm [resolvable:$true] %s324_s2 }
  0x28   :  { %213 = vmatpush.msrb.mxu0 %v89_v5  ;;  %233 = vmatpush.msrb.mxu1 %v121_v8  ;;  %v260_v30 = vld [vmem:[%s736_s5 + $0xa0] sm:$0xff]  ;;  %v38_v31 = vperm.slane %v36_v29, 0  ;;  %v39_v32 = vperm.slane %v36_v29, 1  ;;  %v259_v40 = vld [vmem:[%s736_s5 + $0x98] sm:$0xff]  ;;  %v245_v41 = vld [vmem:[%s736_s5 + $0x28] sm:$0xff] }
  0x29   :  { %296 = vmatpush.msrb.mxu3 %v271_v9  ;;  %277 = vmatpush.msrb.mxu2 %v254_v12  ;;  %v258_v42 = vld [vmem:[%s736_s5 + $0x90] sm:$0xff]  ;;  %v244_v43 = vld [vmem:[%s736_s5 + $0x20] sm:$0xff]  ;;  %v257_v44 = vld [vmem:[%s736_s5 + $0x88] sm:$0xff] }
  0x2a   :  { %v243_v45 = vld [vmem:[%s736_s5 + $0x18] sm:$0xff]  ;;  %v256_v46 = vld [vmem:[%s736_s5 + $0x80] sm:$0xff]  ;;  %v242_v47 = vld [vmem:[%s736_s5 + $0x10] sm:$0xff] }
  0x2b   :  { %297 = vmatpush.msrb.mxu3 %v270_v10  ;;  %278 = vmatpush.msrb.mxu2 %v253_v14  ;;  %v241_v48 = vld [vmem:[%s736_s5 + $0x8] sm:$0xff]  ;;  %v240_v49 = vld [vmem:[%s736_s5] sm:$0xff] }
  0x2c   :  { %v152_v50 = vld [vmem:[%s735_s4] sm:$0x3]  ;;  %s363_s4 = smov [#allocation2]  }
  0x2d   :  { %298 = vmatpush.msrb.mxu3 %v269_v13  ;;  %279 = vmatpush.msrb.mxu2 %v252_v16  ;;  %v155_v51 = vperm.slane %v152_v50, 1  ;;  %v154_v56 = vperm.slane %v152_v50, 0  ;;  %v336_v63 = vld [vmem:[%s737_s6] ss:$0 sm:$0xff]  ;;  %s322_s12 = sshll.u32 %s363_s4, 4  ;;  %s323_s12 = int_to_ptr.vmem [resolvable:$true] %s322_s12 }
  0x2f   :  { %299 = vmatpush.msrb.mxu3 %v268_v15  ;;  %280 = vmatpush.msrb.mxu2 %v251_v18 }
  0x31   :  { %300 = vmatpush.msrb.mxu3 %v267_v17  ;;  %281 = vmatpush.msrb.mxu2 %v250_v20 }
  0x33   :  { %301 = vmatpush.msrb.mxu3 %v266_v19  ;;  %282 = vmatpush.msrb.mxu2 %v249_v22 }
  0x35   :  { %302 = vmatpush.msrb.mxu3 %v265_v21  ;;  %283 = vmatpush.msrb.mxu2 %v248_v24 }
  0x37   :  { %303 = vmatpush.msrb.mxu3 %v264_v23  ;;  %284 = vmatpush.msrb.mxu2 %v247_v26 }
  0x39   :  { %304 = vmatpush.msrb.mxu3 %v263_v25  ;;  %285 = vmatpush.msrb.mxu2 %v246_v39 }
  0x3b   :  { %305 = vmatpush.msrb.mxu3 %v262_v27  ;;  %286 = vmatpush.msrb.mxu2 %v245_v41 }
  0x3d   :  { %306 = vmatpush.msrb.mxu3 %v261_v28  ;;  %287 = vmatpush.msrb.mxu2 %v244_v43 }
  0x3f   :  { %307 = vmatpush.msrb.mxu3 %v260_v30  ;;  %288 = vmatpush.msrb.mxu2 %v243_v45 }
  0x41   :  { %308 = vmatpush.msrb.mxu3 %v259_v40  ;;  %289 = vmatpush.msrb.mxu2 %v242_v47 }
  0x43   :  { %309 = vmatpush.msrb.mxu3 %v258_v42  ;;  %290 = vmatpush.msrb.mxu2 %v241_v48 }
  0x45   :  { %310 = vmatpush.msrb.mxu3 %v257_v44  ;;  %291 = vmatpush.msrb.mxu2 %v240_v49 }
  0x47   :  { %311 = vmatpush.msrb.mxu3 %v256_v46 }
  0x86   :  { %v63_v33 = vpop.f32.mrf.mxu0  ;;  %v83_v34 = vpop.f32.mrf.mxu1 }
  0x87   :  { %v64_v35 = vadd.f32 %v63_v33, %v38_v31  ;;  %v84_v36 = vadd.f32 %v83_v34, %v39_v32 }
  0x89   :  { %v86_v37 = vmax.f32 %v64_v35, 0.0  ;;  %v87_v38 = vmax.f32 %v84_v36, 0.0 }
  0x8b   :  { %174 = vmatmul.f32.vlgmr.msra.gmra.mxu2 %v86_v37  ;;  %214 = vmatmul.f32.vlgmr.msrb.gmra.mxu0 %v86_v37 }
  0x8c   :  { %194 = vmatmul.f32.vlgmr.msra.gmra.mxu3 %v87_v38  ;;  %234 = vmatmul.f32.vlgmr.msrb.gmra.mxu1 %v87_v38 }
 0x108   :  { %v215_v52 = vpop.f32.mrf.mxu0 }
 0x109   :  { %v216_v53 = vadd.f32 %v215_v52, %v155_v51  ;;  %v235_v54 = vpop.f32.mrf.mxu1 }
 0x10b   :  { %v236_v55 = vadd.f32 %v235_v54, %v216_v53 }
 0x10d   :  { %v239_v57 = vmax.f32 %v236_v55, 0.0 }
 0x10e   :  { %v175_v58 = vpop.f32.mrf.mxu2 }
 0x10f   :  { %v176_v59 = vadd.f32 %v175_v58, %v154_v56  ;;  %312 = vmatmul.f32.vlgmr.msrb.gmra.mxu3 %v239_v57  ;;  %v195_v60 = vpop.f32.mrf.mxu3 }
 0x111   :  { %v196_v61 = vadd.f32 %v195_v60, %v176_v59 }
 0x113   :  { %v238_v62 = vmax.f32 %v196_v61, 0.0 }
 0x115   :  { %292 = vmatmul.f32.vlgmr.msrb.gmra.mxu2 %v238_v62 }
 0x192   :  { %v313_v2 = vpop.f32.mrf.mxu3 }
 0x198   :  { %v293_v0 = vpop.f32.mrf.mxu2 }
 0x199   :  { %v294_v1 = vadd.f32 %v336_v63, %v293_v0 }
 0x19b   :  { %v314_v3 = vadd.f32 %v313_v2, %v294_v1 }
 0x19d   :  { %316 = vst [vmem:[#allocation2] sm:$0xff] %v314_v3 }
 0x19e   :  { %327 = dma.vmem_to_hbm [thread:$0]  %s323_s12, 128, %s325_s2, [#allocation3]  }
 0x19f   :  { %361 = dma.done.wait [#allocation3], 128  }
 0x1a0   :  { %362 = vsyncadd [#allocation3], 4294967168 }
 0x1a1   :  { %332 = vsyncpa [#allocation3], 1 }

</bundles_post_ra>
